<compile_context>
chip_gen: v5e
topology: v5e:2x2
jax: 0.10.0
libtpu: 0.0.40
codegen_flags: <defaults>
</compile_context>

<pallas_src>
import numpy as np
import jax
import jax.numpy as jnp
from jax.experimental import pallas as pl
from jax.experimental.pallas import tpu as pltpu

# ---------------- configuration (small, consistent with the module) ----------------
B, L, HORIZON, K = 2, 20, 5, 10
NUM_SEQ = L // K            # 2
NUM_SEG = L // HORIZON      # 4
T_LM, VOCAB, LANG_DIM = 8, 64, 32     # LANG_DIM stands in for DistilBERT's 768
STATE_DIM, ACTION_DIM, OPTION_DIM, HIDDEN = 16, 4, 8, 32
N_CODES, MAX_EP_LEN = 16, 64

BT = B * T_LM               # 16
BS = B * NUM_SEG            # 8
BL = B * L                  # 40
SI_DIM = ACTION_DIM + HIDDEN            # stacked_inputs width (36)
CAT_DIM = ACTION_DIM + 2 * HIDDEN       # [actions|obs_emb|opt_emb] width (68)
DEC_DIM = ACTION_DIM + STATE_DIM        # merged decode width (20)
OUT_COLS = 128                          # lane-dense output width
ACT_COLS = ACTION_DIM + STATE_DIM + HIDDEN + 1   # activation slab width (53)

# ---- weight slab row layout (128 lanes wide, zero padded, 8-aligned offsets) ----
_W_LM, _B_LM = 0, 32        # (32,32) / (1,32)
_W_ZE, _B_ZE = 40, 72       # (32, 8) / (1, 8)
_W_ST, _B_ST = 80, 96       # (16,32) / (1,32)
_W_OPT, _B_OPT = 104, 112   # ( 8,32) / (1,32)
_W_DN, _B_DN = 120, 192     # (68,36) / (1,36)
_W_DEC, _B_DEC = 200, 240   # (36,128) folded+lane-padded decode / (1,128)
W_SLAB_ROWS = 248

# ---- constant-selector slab row layout (16 lanes wide) ----
_MEAN, _REP, _OPTS, _SEGT, _CB, _CBT = 0, 8, 16, 56, 64, 80
SEL_ROWS, SEL_COLS = 88, 16

_VMEM_SPEC = pl.BlockSpec(memory_space=pltpu.MemorySpace.VMEM)


# ---------------------------------- Pallas kernel ----------------------------------
def hrl_fused_kernel(tok_ref, act_ref, sel_ref, w_ref, out_ref):
    f32, bf16 = jnp.float32, jnp.bfloat16

    def mm(a, b):  # bf16 operands, f32 accumulation (MXU-native on v5e/v6e/v7x)
        return jnp.dot(a.astype(bf16), b.astype(bf16), preferred_element_type=f32)

    def mean_all(x, n):
        return jnp.sum(jnp.sum(x, axis=1, keepdims=True), axis=0, keepdims=True) * (1.0 / n)

    # ---- unpack weight slab (static, 8-aligned row windows, lane offset 0) ----
    w_lm  = w_ref[_W_LM:_W_LM + LANG_DIM, :LANG_DIM]
    b_lm  = w_ref[_B_LM:_B_LM + 1, :LANG_DIM]
    w_ze  = w_ref[_W_ZE:_W_ZE + LANG_DIM, :OPTION_DIM]
    b_ze  = w_ref[_B_ZE:_B_ZE + 1, :OPTION_DIM]
    w_st  = w_ref[_W_ST:_W_ST + STATE_DIM, :HIDDEN]
    b_st  = w_ref[_B_ST:_B_ST + 1, :HIDDEN]
    w_op  = w_ref[_W_OPT:_W_OPT + OPTION_DIM, :HIDDEN]
    b_op  = w_ref[_B_OPT:_B_OPT + 1, :HIDDEN]
    w_dn  = w_ref[_W_DN:_W_DN + CAT_DIM, :SI_DIM]
    b_dn  = w_ref[_B_DN:_B_DN + 1, :SI_DIM]
    w_dec = w_ref[_W_DEC:_W_DEC + SI_DIM, :]        # (36, 128) lane-padded
    b_dec = w_ref[_B_DEC:_B_DEC + 1, :]             # (1, 128)

    # ---- unpack constant-selector slab ----
    mean_mat = sel_ref[_MEAN:_MEAN + B, :BT]               # (B, B*T)
    rep_mat  = sel_ref[_REP:_REP + BS, :B]                 # (B*S, B)
    opt_sel  = sel_ref[_OPTS:_OPTS + BL, :BS]              # (B*L, B*S)
    seg_tile = sel_ref[_SEGT:_SEGT + BS, :OPTION_DIM]      # (B*S, OPT)
    cb       = sel_ref[_CB:_CB + N_CODES, :OPTION_DIM]     # (C, OPT)
    cb_t     = sel_ref[_CBT:_CBT + OPTION_DIM, :N_CODES]   # (OPT, C)

    # ---- unpack per-step activation slab ----
    acts = act_ref[:, 0:ACTION_DIM]                                             # (B*L, A)
    sts  = act_ref[:, ACTION_DIM:ACTION_DIM + STATE_DIM]                        # (B*L, S)
    tim  = act_ref[:, ACTION_DIM + STATE_DIM:ACTION_DIM + STATE_DIM + HIDDEN]   # (B*L, H)
    msk  = act_ref[:, ACTION_DIM + STATE_DIM + HIDDEN:ACT_COLS]                 # (B*L, 1)

    # ---- language model stand-in: dense GELU projection over masked token embeddings ----
    # TODO(synk): pretrained DistilBERT transformer stack cannot be reproduced in-script;
    # a token-embedding + dense GELU projection stands in for last_hidden_state.
    lm = jax.nn.gelu(mm(tok_ref[...], w_lm) + b_lm, approximate=True)           # (B*T, LANG)

    # ---- OptionSelector: word mean (excl. CLS) -> z_e -> queries -> soft code lookup ----
    lang_mean = mm(mean_mat, lm)                                                # (B, LANG)
    z_e = mm(lang_mean, w_ze) + b_ze                                            # (B, OPT)
    queries = mm(rep_mat, z_e) + seg_tile                                       # (B*S, OPT)
    logits = mm(queries, cb_t)                                                  # (B*S, C)
    mx = jnp.max(logits, axis=-1, keepdims=True)
    ex = jnp.exp(logits - mx)
    p = ex / jnp.sum(ex, axis=-1, keepdims=True)                                # exact softmax
    selected = mm(p, cb)                                                        # (B*S, OPT)

    ent_rows = -jnp.sum(p * jnp.log(p + 1e-8), axis=-1, keepdims=True)          # (B*S, 1)
    ent = jnp.sum(ent_rows, axis=0, keepdims=True) * (1.0 / BS)                 # (1, 1)
    dq = queries - selected          # stop_gradient(selected) is identity in forward
    commit = mean_all(dq * dq, BS * OPTION_DIM)                                 # (1, 1)

    # ---- spread each chunk's option over its rows; option / state embeddings ----
    opt_rows = mm(opt_sel, selected)                                            # (B*L, OPT)
    opt_emb = jnp.tanh(mm(opt_rows, w_op) + b_op)                               # (B*L, H)
    st_emb  = jnp.tanh(mm(sts, w_st) + b_st)                                    # (B*L, H)
    obs_emb = (st_emb + tim) * msk                                              # (B*L, H)

    # ---- fused one-step denoiser: single matmul over [actions | obs_emb | opt_emb] ----
    # TODO(synk): diff_trainer.train_iteration mutates optimizer state only; skipped.
    stacked = jnp.concatenate([acts, obs_emb], axis=1)                          # (B*L, 36)
    cat = jnp.concatenate([stacked, opt_emb], axis=1)                           # (B*L, 68)
    pred = mm(cat, w_dn) + b_dn                                                 # (B*L, 36)
    d = pred - stacked
    diff = mean_all(d * d, BL * SI_DIM)                                         # (1, 1)

    # ---- decode: obs_recon = pred[:, A:] slice folded into zero-padded, lane-dense w_dec ----
    dec = mm(pred, w_dec) + b_dec                                               # (B*L, 128)
    out_ref[0:BL, :] = dec

    # ---- scalar losses packed into one extra 8-row block: [diff, commit, entropy, 0...] ----
    row = jax.lax.broadcasted_iota(jnp.int32, (8, OUT_COLS), 0)
    lane = jax.lax.broadcasted_iota(jnp.int32, (8, OUT_COLS), 1)
    stats = (diff * ((row == 0) & (lane == 0)).astype(f32)
             + commit * ((row == 0) & (lane == 1)).astype(f32)
             + ent * ((row == 0) & (lane == 2)).astype(f32))
    out_ref[BL:BL + 8, :] = stats


# ------------------------------- parameters & packing -------------------------------
def init_params(key):
    ks = jax.random.split(key, 12)
    p = {}
    p['tok_emb']   = jax.random.normal(ks[0], (VOCAB, LANG_DIM), jnp.float32) * 0.02
    p['w_lm']      = jax.random.normal(ks[1], (LANG_DIM, LANG_DIM), jnp.float32) * 0.05
    p['b_lm']      = jnp.zeros((LANG_DIM,), jnp.float32)
    p['w_state']   = jax.random.normal(ks[2], (STATE_DIM, HIDDEN), jnp.float32) * 0.05
    p['b_state']   = jnp.zeros((HIDDEN,), jnp.float32)
    p['w_ze']      = jax.random.normal(ks[3], (LANG_DIM, OPTION_DIM), jnp.float32) * 0.05
    p['b_ze']      = jnp.zeros((OPTION_DIM,), jnp.float32)
    p['seg_emb']   = jax.random.normal(ks[4], (NUM_SEG, OPTION_DIM), jnp.float32) * 0.05
    p['codebook']  = jax.random.normal(ks[5], (N_CODES, OPTION_DIM), jnp.float32) * 0.5
    p['time_emb']  = jax.random.normal(ks[6], (MAX_EP_LEN, HIDDEN), jnp.float32) * 0.02
    p['w_opt']     = jax.random.normal(ks[7], (OPTION_DIM, HIDDEN), jnp.float32) * 0.05
    p['b_opt']     = jnp.zeros((HIDDEN,), jnp.float32)
    p['w_denoise'] = jax.random.normal(ks[8], (CAT_DIM, SI_DIM), jnp.float32) * 0.05
    p['b_denoise'] = jnp.zeros((SI_DIM,), jnp.float32)
    p['w_dec_act'] = jax.random.normal(ks[9], (HIDDEN, ACTION_DIM), jnp.float32) * 0.05
    p['b_dec_act'] = jnp.zeros((ACTION_DIM,), jnp.float32)
    p['w_dec_st']  = jax.random.normal(ks[10], (HIDDEN, STATE_DIM), jnp.float32) * 0.05
    p['b_dec_st']  = jnp.zeros((STATE_DIM,), jnp.float32)
    return p


def _place(slab, row, a):
    a = jnp.asarray(a, jnp.float32)
    if a.ndim == 1:
        a = a[None, :]
    return slab.at[row:row + a.shape[0], :a.shape[1]].set(a)


def prepare_params(params):
    """One-time packing of weights + constant selector matrices (not per-step)."""
    f32 = jnp.float32

    # --- weight slab ---
    w = jnp.zeros((W_SLAB_ROWS, OUT_COLS), f32)
    w = _place(w, _W_LM, params['w_lm']);      w = _place(w, _B_LM, params['b_lm'])
    w = _place(w, _W_ZE, params['w_ze']);      w = _place(w, _B_ZE, params['b_ze'])
    w = _place(w, _W_ST, params['w_state']);   w = _place(w, _B_ST, params['b_state'])
    w = _place(w, _W_OPT, params['w_opt']);    w = _place(w, _B_OPT, params['b_opt'])
    w = _place(w, _W_DN, params['w_denoise']); w = _place(w, _B_DN, params['b_denoise'])
    # decode: fold obs_recon = pred[:, A:] slice (zero rows) + lane-pad to 128 (zero cols)
    w_dec = jnp.concatenate([params['w_dec_act'], params['w_dec_st']], axis=1)   # (H, 20)
    w_dec = jnp.concatenate([jnp.zeros((ACTION_DIM, DEC_DIM), f32), w_dec], axis=0)
    w = _place(w, _W_DEC, w_dec)
    w = _place(w, _B_DEC, jnp.concatenate([params['b_dec_act'], params['b_dec_st']]))

    # --- constant selector slab (host-side numpy constants + small params) ---
    col = np.arange(BT)[None, :]
    rowi = np.arange(B)[:, None]
    # NOTE: matches torch word_embeddings.mean(1): plain mean over the T-1 word tokens.
    mean_mat = (((col // T_LM) == rowi) & ((col % T_LM) != 0)).astype(np.float32) / (T_LM - 1)
    rep_mat = ((np.arange(BS)[:, None] // NUM_SEG) == np.arange(B)[None, :]).astype(np.float32)
    r = np.arange(BL)
    seg_of_row = (((r % L) // K) * K) // HORIZON
    sel_idx = (r // L) * NUM_SEG + seg_of_row
    opt_sel = (sel_idx[:, None] == np.arange(BS)[None, :]).astype(np.float32)

    sel = jnp.zeros((SEL_ROWS, SEL_COLS), f32)
    sel = _place(sel, _MEAN, mean_mat)
    sel = _place(sel, _REP, rep_mat)
    sel = _place(sel, _OPTS, opt_sel)
    sel = _place(sel, _SEGT, jnp.tile(params['seg_emb'], (B, 1)))
    sel = _place(sel, _CB, params['codebook'])
    sel = _place(sel, _CBT, params['codebook'].T)

    return {'w_slab': w, 'sel_slab': sel,
            'tok_emb': params['tok_emb'].astype(f32),
            'time_emb': params['time_emb'].astype(f32)}


# ---------------------------------- HRLModel.forward ----------------------------------
def _hrl_step(prep, lm_input_ids, lm_attention_mask, states, actions, timesteps,
              attention_mask):
    f32 = jnp.float32

    # Gathers stay in JAX (data-dependent row lookups); everything else is packed.
    tok = prep['tok_emb'][lm_input_ids] * lm_attention_mask[..., None].astype(f32)
    tok2 = tok.reshape(BT, LANG_DIM)
    time2 = prep['time_emb'][jnp.clip(timesteps, 0, MAX_EP_LEN - 1)].reshape(BL, HIDDEN)
    act_slab = jnp.concatenate(
        [actions.reshape(BL, ACTION_DIM).astype(f32),
         states.reshape(BL, STATE_DIM).astype(f32),
         time2,
         attention_mask.reshape(BL, 1).astype(f32)], axis=1)                    # (B*L, 53)

    out = pl.pallas_call(
        hrl_fused_kernel,
        out_shape=jax.ShapeDtypeStruct((BL + 8, OUT_COLS), f32),
        in_specs=[_VMEM_SPEC, _VMEM_SPEC, _VMEM_SPEC, _VMEM_SPEC],
        out_specs=_VMEM_SPEC,
        cost_estimate=pl.CostEstimate(flops=671_232, transcendentals=4096,
                                      bytes_accessed=167_712),
    )(tok2, act_slab, prep['sel_slab'], prep['w_slab'])

    dec = out[:BL, :DEC_DIM].reshape(B * NUM_SEQ, K, DEC_DIM)
    decode_outputs = {'action_preds': dec[..., :ACTION_DIM],
                      'state_preds': dec[..., ACTION_DIM:]}

    # state_reconstruct / lang_reconstruct are forced False inside the reference forward.
    return {
        'dt': decode_outputs,
        'state_rc': (None, None),
        'lang_rc': (None, None),
        'actions': actions.reshape(B * NUM_SEQ, K, ACTION_DIM),
        'attention_mask': attention_mask.reshape(B * NUM_SEQ, K),
        'commitment_loss': out[BL, 1],
        'diff_loss': out[BL, 0],
        'entropy': out[BL, 2],
    }


_hrl_step_jit = jax.jit(_hrl_step)


def hrl_forward(prep, lm_input_ids, lm_attention_mask, states, actions, timesteps,
                iter_num, ind, diff_train_num, attention_mask=None):
    # TODO(synk): the diff_train_num loop of diff_trainer.train_iteration only mutates
    # optimizer state (training side effect); skipped in this forward-only kernel.
    del iter_num, ind, diff_train_num
    return _hrl_step_jit(prep, lm_input_ids, lm_attention_mask, states, actions,
                         timesteps, attention_mask)


# --------------------------------------- main ---------------------------------------
if __name__ == "__main__":
    key = jax.random.PRNGKey(0)
    pkey, dkey = jax.random.split(key)
    params = init_params(pkey)
    prep = prepare_params(params)            # one-time packing (not per-step)

    ks = jax.random.split(dkey, 3)
    lm_input_ids = jax.random.randint(ks[0], (B, T_LM), 0, VOCAB, dtype=jnp.int32)
    lm_attention_mask = jnp.ones((B, T_LM), dtype=jnp.int32)
    states = jax.random.normal(ks[1], (B, L, STATE_DIM), dtype=jnp.float32)
    actions = jax.random.normal(ks[2], (B, L, ACTION_DIM), dtype=jnp.float32)
    timesteps = jnp.broadcast_to(jnp.arange(L, dtype=jnp.int32)[None, :], (B, L))
    attention_mask = jnp.ones((B, L), dtype=jnp.int32)

    out = hrl_forward(prep, lm_input_ids, lm_attention_mask, states, actions,
                      timesteps, iter_num=0, ind=0, diff_train_num=0,
                      attention_mask=attention_mask)
    jax.tree_util.tree_map(jax.block_until_ready, out)
    print("KERNEL_OK")
</pallas_src>

<mosaic_0001>
module attributes {stable_mosaic.version = 11 : i64} {
  func.func @hrl_fused_kernel(%arg0: memref<16x32xf32, #tpu.memory_space<vmem>>, %arg1: memref<40x53xf32, #tpu.memory_space<vmem>>, %arg2: memref<88x16xf32, #tpu.memory_space<vmem>>, %arg3: memref<248x128xf32, #tpu.memory_space<vmem>>, %arg4: memref<48x128xf32, #tpu.memory_space<vmem>>) attributes {dimension_semantics = [], scalar_prefetch = 0 : i64, scratch_operands = 0 : i64, tpu.core_type = #tpu.core_type<tc>} {
    %c0 = arith.constant 0 : index
    %c0_0 = arith.constant 0 : index
    %0 = vector.load %arg3[%c0, %c0_0] : memref<248x128xf32, #tpu.memory_space<vmem>>, vector<32x32xf32>
    %c32 = arith.constant 32 : index
    %c0_1 = arith.constant 0 : index
    %1 = vector.load %arg3[%c32, %c0_1] : memref<248x128xf32, #tpu.memory_space<vmem>>, vector<1x32xf32>
    %c40 = arith.constant 40 : index
    %c0_2 = arith.constant 0 : index
    %2 = vector.load %arg3[%c40, %c0_2] : memref<248x128xf32, #tpu.memory_space<vmem>>, vector<32x8xf32>
    %c72 = arith.constant 72 : index
    %c0_3 = arith.constant 0 : index
    %3 = vector.load %arg3[%c72, %c0_3] : memref<248x128xf32, #tpu.memory_space<vmem>>, vector<1x8xf32>
    %c80 = arith.constant 80 : index
    %c0_4 = arith.constant 0 : index
    %4 = vector.load %arg3[%c80, %c0_4] : memref<248x128xf32, #tpu.memory_space<vmem>>, vector<16x32xf32>
    %c96 = arith.constant 96 : index
    %c0_5 = arith.constant 0 : index
    %5 = vector.load %arg3[%c96, %c0_5] : memref<248x128xf32, #tpu.memory_space<vmem>>, vector<1x32xf32>
    %c104 = arith.constant 104 : index
    %c0_6 = arith.constant 0 : index
    %6 = vector.load %arg3[%c104, %c0_6] : memref<248x128xf32, #tpu.memory_space<vmem>>, vector<8x32xf32>
    %c112 = arith.constant 112 : index
    %c0_7 = arith.constant 0 : index
    %7 = vector.load %arg3[%c112, %c0_7] : memref<248x128xf32, #tpu.memory_space<vmem>>, vector<1x32xf32>
    %c120 = arith.constant 120 : index
    %c0_8 = arith.constant 0 : index
    %8 = vector.load %arg3[%c120, %c0_8] : memref<248x128xf32, #tpu.memory_space<vmem>>, vector<68x36xf32>
    %c192 = arith.constant 192 : index
    %c0_9 = arith.constant 0 : index
    %9 = vector.load %arg3[%c192, %c0_9] : memref<248x128xf32, #tpu.memory_space<vmem>>, vector<1x36xf32>
    %c200 = arith.constant 200 : index
    %c0_10 = arith.constant 0 : index
    %10 = vector.load %arg3[%c200, %c0_10] : memref<248x128xf32, #tpu.memory_space<vmem>>, vector<36x128xf32>
    %c240 = arith.constant 240 : index
    %c0_11 = arith.constant 0 : index
    %11 = vector.load %arg3[%c240, %c0_11] : memref<248x128xf32, #tpu.memory_space<vmem>>, vector<1x128xf32>
    %c0_12 = arith.constant 0 : index
    %c0_13 = arith.constant 0 : index
    %12 = vector.load %arg2[%c0_12, %c0_13] : memref<88x16xf32, #tpu.memory_space<vmem>>, vector<2x16xf32>
    %c8 = arith.constant 8 : index
    %c0_14 = arith.constant 0 : index
    %13 = vector.load %arg2[%c8, %c0_14] : memref<88x16xf32, #tpu.memory_space<vmem>>, vector<8x2xf32>
    %c16 = arith.constant 16 : index
    %c0_15 = arith.constant 0 : index
    %14 = vector.load %arg2[%c16, %c0_15] : memref<88x16xf32, #tpu.memory_space<vmem>>, vector<40x8xf32>
    %c56 = arith.constant 56 : index
    %c0_16 = arith.constant 0 : index
    %15 = vector.load %arg2[%c56, %c0_16] : memref<88x16xf32, #tpu.memory_space<vmem>>, vector<8x8xf32>
    %c64 = arith.constant 64 : index
    %c0_17 = arith.constant 0 : index
    %16 = vector.load %arg2[%c64, %c0_17] : memref<88x16xf32, #tpu.memory_space<vmem>>, vector<16x8xf32>
    %c80_18 = arith.constant 80 : index
    %c0_19 = arith.constant 0 : index
    %17 = vector.load %arg2[%c80_18, %c0_19] : memref<88x16xf32, #tpu.memory_space<vmem>>, vector<8x16xf32>
    %c0_20 = arith.constant 0 : index
    %c0_21 = arith.constant 0 : index
    %18 = vector.load %arg1[%c0_20, %c0_21] : memref<40x53xf32, #tpu.memory_space<vmem>>, vector<40x4xf32>
    %c0_22 = arith.constant 0 : index
    %c4 = arith.constant 4 : index
    %19 = vector.load %arg1[%c0_22, %c4] : memref<40x53xf32, #tpu.memory_space<vmem>>, vector<40x16xf32>
    %c0_23 = arith.constant 0 : index
    %c20 = arith.constant 20 : index
    %20 = vector.load %arg1[%c0_23, %c20] : memref<40x53xf32, #tpu.memory_space<vmem>>, vector<40x32xf32>
    %c0_24 = arith.constant 0 : index
    %c52 = arith.constant 52 : index
    %21 = vector.load %arg1[%c0_24, %c52] : memref<40x53xf32, #tpu.memory_space<vmem>>, vector<40x1xf32>
    %c0_25 = arith.constant 0 : index
    %c0_26 = arith.constant 0 : index
    %22 = vector.load %arg0[%c0_25, %c0_26] : memref<16x32xf32, #tpu.memory_space<vmem>>, vector<16x32xf32>
    %23 = arith.truncf %22 : vector<16x32xf32> to vector<16x32xbf16>
    %24 = arith.truncf %0 : vector<32x32xf32> to vector<32x32xbf16>
    %cst = arith.constant dense<0.000000e+00> : vector<16x32xf32>
    %25 = tpu.matmul %23, %24, %cst {dimension_numbers = #tpu.dot_dimension_numbers<[1], [0], [0], [1], [0, 0, 1, 1], [], []>} : vector<16x32xbf16>, vector<32x32xbf16>, vector<16x32xf32> -> vector<16x32xf32>
    %26 = vector.broadcast %1 : vector<1x32xf32> to vector<16x32xf32>
    %27 = arith.addf %25, %26 : vector<16x32xf32>
    %28 = arith.mulf %27, %27 : vector<16x32xf32>
    %29 = arith.mulf %27, %28 : vector<16x32xf32>
    %cst_27 = arith.constant 4.471500e-02 : f32
    %30 = vector.broadcast %cst_27 : f32 to vector<16x32xf32>
    %31 = arith.mulf %30, %29 : vector<16x32xf32>
    %32 = arith.addf %27, %31 : vector<16x32xf32>
    %cst_28 = arith.constant 0.797884583 : f32
    %33 = vector.broadcast %cst_28 : f32 to vector<16x32xf32>
    %34 = arith.mulf %33, %32 : vector<16x32xf32>
    %35 = math.tanh %34 : vector<16x32xf32>
    %cst_29 = arith.constant 1.000000e+00 : f32
    %36 = vector.broadcast %cst_29 : f32 to vector<16x32xf32>
    %37 = arith.addf %36, %35 : vector<16x32xf32>
    %cst_30 = arith.constant 5.000000e-01 : f32
    %38 = vector.broadcast %cst_30 : f32 to vector<16x32xf32>
    %39 = arith.mulf %38, %37 : vector<16x32xf32>
    %40 = arith.mulf %27, %39 : vector<16x32xf32>
    %41 = arith.truncf %12 : vector<2x16xf32> to vector<2x16xbf16>
    %42 = arith.truncf %40 : vector<16x32xf32> to vector<16x32xbf16>
    %cst_31 = arith.constant dense<0.000000e+00> : vector<2x32xf32>
    %43 = tpu.matmul %41, %42, %cst_31 {dimension_numbers = #tpu.dot_dimension_numbers<[1], [0], [0], [1], [0, 0, 1, 1], [], []>} : vector<2x16xbf16>, vector<16x32xbf16>, vector<2x32xf32> -> vector<2x32xf32>
    %44 = arith.truncf %43 : vector<2x32xf32> to vector<2x32xbf16>
    %45 = arith.truncf %2 : vector<32x8xf32> to vector<32x8xbf16>
    %cst_32 = arith.constant dense<0.000000e+00> : vector<2x8xf32>
    %46 = tpu.matmul %44, %45, %cst_32 {dimension_numbers = #tpu.dot_dimension_numbers<[1], [0], [0], [1], [0, 0, 1, 1], [], []>} : vector<2x32xbf16>, vector<32x8xbf16>, vector<2x8xf32> -> vector<2x8xf32>
    %47 = vector.broadcast %3 : vector<1x8xf32> to vector<2x8xf32>
    %48 = arith.addf %46, %47 : vector<2x8xf32>
    %49 = arith.truncf %13 : vector<8x2xf32> to vector<8x2xbf16>
    %50 = arith.truncf %48 : vector<2x8xf32> to vector<2x8xbf16>
    %cst_33 = arith.constant dense<0.000000e+00> : vector<8x8xf32>
    %51 = tpu.matmul %49, %50, %cst_33 {dimension_numbers = #tpu.dot_dimension_numbers<[1], [0], [0], [1], [0, 0, 1, 1], [], []>} : vector<8x2xbf16>, vector<2x8xbf16>, vector<8x8xf32> -> vector<8x8xf32>
    %52 = arith.addf %51, %15 : vector<8x8xf32>
    %53 = arith.truncf %52 : vector<8x8xf32> to vector<8x8xbf16>
    %54 = arith.truncf %17 : vector<8x16xf32> to vector<8x16xbf16>
    %cst_34 = arith.constant dense<0.000000e+00> : vector<8x16xf32>
    %55 = tpu.matmul %53, %54, %cst_34 {dimension_numbers = #tpu.dot_dimension_numbers<[1], [0], [0], [1], [0, 0, 1, 1], [], []>} : vector<8x8xbf16>, vector<8x16xbf16>, vector<8x16xf32> -> vector<8x16xf32>
    %cst_35 = arith.constant dense<0xFF800000> : vector<8xf32>
    %56 = vector.multi_reduction <maximumf>, %55, %cst_35 [1] : vector<8x16xf32> to vector<8xf32>
    %57 = vector.shape_cast %56 : vector<8xf32> to vector<8x1xf32>
    %58 = vector.broadcast %57 : vector<8x1xf32> to vector<8x16xf32>
    %59 = arith.subf %55, %58 : vector<8x16xf32>
    %60 = math.exp %59 : vector<8x16xf32>
    %cst_36 = arith.constant dense<0.000000e+00> : vector<8xf32>
    %61 = vector.multi_reduction <add>, %60, %cst_36 [1] : vector<8x16xf32> to vector<8xf32>
    %62 = vector.shape_cast %61 : vector<8xf32> to vector<8x1xf32>
    %63 = vector.broadcast %62 : vector<8x1xf32> to vector<8x16xf32>
    %64 = arith.divf %60, %63 : vector<8x16xf32>
    %65 = arith.truncf %64 : vector<8x16xf32> to vector<8x16xbf16>
    %66 = arith.truncf %16 : vector<16x8xf32> to vector<16x8xbf16>
    %cst_37 = arith.constant dense<0.000000e+00> : vector<8x8xf32>
    %67 = tpu.matmul %65, %66, %cst_37 {dimension_numbers = #tpu.dot_dimension_numbers<[1], [0], [0], [1], [0, 0, 1, 1], [], []>} : vector<8x16xbf16>, vector<16x8xbf16>, vector<8x8xf32> -> vector<8x8xf32>
    %cst_38 = arith.constant 9.99999993E-9 : f32
    %68 = vector.broadcast %cst_38 : f32 to vector<8x16xf32>
    %69 = arith.addf %64, %68 : vector<8x16xf32>
    %70 = math.log %69 : vector<8x16xf32>
    %71 = arith.mulf %64, %70 : vector<8x16xf32>
    %cst_39 = arith.constant dense<0.000000e+00> : vector<8xf32>
    %72 = vector.multi_reduction <add>, %71, %cst_39 [1] : vector<8x16xf32> to vector<8xf32>
    %73 = vector.shape_cast %72 : vector<8xf32> to vector<8x1xf32>
    %cst_40 = arith.constant 0.000000e+00 : f32
    %74 = vector.broadcast %cst_40 : f32 to vector<8x1xf32>
    %75 = arith.subf %74, %73 : vector<8x1xf32>
    %cst_41 = arith.constant dense<0.000000e+00> : vector<1xf32>
    %76 = vector.multi_reduction <add>, %75, %cst_41 [0] : vector<8x1xf32> to vector<1xf32>
    %77 = vector.shape_cast %76 : vector<1xf32> to vector<1x1xf32>
    %cst_42 = arith.constant 1.250000e-01 : f32
    %78 = vector.broadcast %cst_42 : f32 to vector<1x1xf32>
    %79 = arith.mulf %77, %78 : vector<1x1xf32>
    %80 = arith.subf %52, %67 : vector<8x8xf32>
    %81 = arith.mulf %80, %80 : vector<8x8xf32>
    %cst_43 = arith.constant dense<0.000000e+00> : vector<8xf32>
    %82 = vector.multi_reduction <add>, %81, %cst_43 [1] : vector<8x8xf32> to vector<8xf32>
    %83 = vector.shape_cast %82 : vector<8xf32> to vector<8x1xf32>
    %cst_44 = arith.constant dense<0.000000e+00> : vector<1xf32>
    %84 = vector.multi_reduction <add>, %83, %cst_44 [0] : vector<8x1xf32> to vector<1xf32>
    %85 = vector.shape_cast %84 : vector<1xf32> to vector<1x1xf32>
    %cst_45 = arith.constant 1.562500e-02 : f32
    %86 = vector.broadcast %cst_45 : f32 to vector<1x1xf32>
    %87 = arith.mulf %85, %86 : vector<1x1xf32>
    %88 = arith.truncf %14 : vector<40x8xf32> to vector<40x8xbf16>
    %89 = arith.truncf %67 : vector<8x8xf32> to vector<8x8xbf16>
    %cst_46 = arith.constant dense<0.000000e+00> : vector<40x8xf32>
    %90 = tpu.matmul %88, %89, %cst_46 {dimension_numbers = #tpu.dot_dimension_numbers<[1], [0], [0], [1], [0, 0, 1, 1], [], []>} : vector<40x8xbf16>, vector<8x8xbf16>, vector<40x8xf32> -> vector<40x8xf32>
    %91 = arith.truncf %90 : vector<40x8xf32> to vector<40x8xbf16>
    %92 = arith.truncf %6 : vector<8x32xf32> to vector<8x32xbf16>
    %cst_47 = arith.constant dense<0.000000e+00> : vector<40x32xf32>
    %93 = tpu.matmul %91, %92, %cst_47 {dimension_numbers = #tpu.dot_dimension_numbers<[1], [0], [0], [1], [0, 0, 1, 1], [], []>} : vector<40x8xbf16>, vector<8x32xbf16>, vector<40x32xf32> -> vector<40x32xf32>
    %94 = vector.broadcast %7 : vector<1x32xf32> to vector<40x32xf32>
    %95 = arith.addf %93, %94 : vector<40x32xf32>
    %96 = math.tanh %95 : vector<40x32xf32>
    %97 = arith.truncf %19 : vector<40x16xf32> to vector<40x16xbf16>
    %98 = arith.truncf %4 : vector<16x32xf32> to vector<16x32xbf16>
    %cst_48 = arith.constant dense<0.000000e+00> : vector<40x32xf32>
    %99 = tpu.matmul %97, %98, %cst_48 {dimension_numbers = #tpu.dot_dimension_numbers<[1], [0], [0], [1], [0, 0, 1, 1], [], []>} : vector<40x16xbf16>, vector<16x32xbf16>, vector<40x32xf32> -> vector<40x32xf32>
    %100 = vector.broadcast %5 : vector<1x32xf32> to vector<40x32xf32>
    %101 = arith.addf %99, %100 : vector<40x32xf32>
    %102 = math.tanh %101 : vector<40x32xf32>
    %103 = arith.addf %102, %20 : vector<40x32xf32>
    %104 = vector.broadcast %21 : vector<40x1xf32> to vector<40x32xf32>
    %105 = arith.mulf %103, %104 : vector<40x32xf32>
    %106 = tpu.concatenate %18, %105 in 1 : vector<40x4xf32>, vector<40x32xf32> -> vector<40x36xf32>
    %107 = tpu.concatenate %106, %96 in 1 : vector<40x36xf32>, vector<40x32xf32> -> vector<40x68xf32>
    %108 = arith.truncf %107 : vector<40x68xf32> to vector<40x68xbf16>
    %109 = arith.truncf %8 : vector<68x36xf32> to vector<68x36xbf16>
    %cst_49 = arith.constant dense<0.000000e+00> : vector<40x36xf32>
    %110 = tpu.matmul %108, %109, %cst_49 {dimension_numbers = #tpu.dot_dimension_numbers<[1], [0], [0], [1], [0, 0, 1, 1], [], []>} : vector<40x68xbf16>, vector<68x36xbf16>, vector<40x36xf32> -> vector<40x36xf32>
    %111 = vector.broadcast %9 : vector<1x36xf32> to vector<40x36xf32>
    %112 = arith.addf %110, %111 : vector<40x36xf32>
    %113 = arith.subf %112, %106 : vector<40x36xf32>
    %114 = arith.mulf %113, %113 : vector<40x36xf32>
    %cst_50 = arith.constant dense<0.000000e+00> : vector<40xf32>
    %115 = vector.multi_reduction <add>, %114, %cst_50 [1] : vector<40x36xf32> to vector<40xf32>
    %116 = vector.shape_cast %115 : vector<40xf32> to vector<40x1xf32>
    %cst_51 = arith.constant dense<0.000000e+00> : vector<1xf32>
    %117 = vector.multi_reduction <add>, %116, %cst_51 [0] : vector<40x1xf32> to vector<1xf32>
    %118 = vector.shape_cast %117 : vector<1xf32> to vector<1x1xf32>
    %cst_52 = arith.constant 6.94444461E-4 : f32
    %119 = vector.broadcast %cst_52 : f32 to vector<1x1xf32>
    %120 = arith.mulf %118, %119 : vector<1x1xf32>
    %121 = arith.truncf %112 : vector<40x36xf32> to vector<40x36xbf16>
    %122 = arith.truncf %10 : vector<36x128xf32> to vector<36x128xbf16>
    %cst_53 = arith.constant dense<0.000000e+00> : vector<40x128xf32>
    %123 = tpu.matmul %121, %122, %cst_53 {dimension_numbers = #tpu.dot_dimension_numbers<[1], [0], [0], [1], [0, 0, 1, 1], [], []>} : vector<40x36xbf16>, vector<36x128xbf16>, vector<40x128xf32> -> vector<40x128xf32>
    %124 = vector.broadcast %11 : vector<1x128xf32> to vector<40x128xf32>
    %125 = arith.addf %123, %124 : vector<40x128xf32>
    %c0_54 = arith.constant 0 : index
    %c0_55 = arith.constant 0 : index
    %126 = vector.load %arg4[%c0_54, %c0_55] : memref<48x128xf32, #tpu.memory_space<vmem>>, vector<40x128xf32>
    tpu.vector_store %arg4[%c0_54, %c0_55], %125 {strides = array<i32>} : memref<48x128xf32, #tpu.memory_space<vmem>>, vector<40x128xf32>,
    %127 = tpu.iota {dimensions = array<i32: 0>} : vector<8x128xi32>
    %128 = tpu.iota {dimensions = array<i32: 1>} : vector<8x128xi32>
    %c0_i32 = arith.constant 0 : i32
    %129 = vector.broadcast %c0_i32 : i32 to vector<8x128xi32>
    %130 = arith.cmpi eq, %127, %129 : vector<8x128xi32>
    %c0_i32_56 = arith.constant 0 : i32
    %131 = vector.broadcast %c0_i32_56 : i32 to vector<8x128xi32>
    %132 = arith.cmpi eq, %128, %131 : vector<8x128xi32>
    %133 = arith.andi %130, %132 : vector<8x128xi1>
    %134 = arith.extui %133 : vector<8x128xi1> to vector<8x128xi32>
    %135 = arith.sitofp %134 : vector<8x128xi32> to vector<8x128xf32>
    %136 = vector.broadcast %120 : vector<1x1xf32> to vector<8x128xf32>
    %137 = arith.mulf %136, %135 : vector<8x128xf32>
    %c0_i32_57 = arith.constant 0 : i32
    %138 = vector.broadcast %c0_i32_57 : i32 to vector<8x128xi32>
    %139 = arith.cmpi eq, %127, %138 : vector<8x128xi32>
    %c1_i32 = arith.constant 1 : i32
    %140 = vector.broadcast %c1_i32 : i32 to vector<8x128xi32>
    %141 = arith.cmpi eq, %128, %140 : vector<8x128xi32>
    %142 = arith.andi %139, %141 : vector<8x128xi1>
    %143 = arith.extui %142 : vector<8x128xi1> to vector<8x128xi32>
    %144 = arith.sitofp %143 : vector<8x128xi32> to vector<8x128xf32>
    %145 = vector.broadcast %87 : vector<1x1xf32> to vector<8x128xf32>
    %146 = arith.mulf %145, %144 : vector<8x128xf32>
    %147 = arith.addf %137, %146 : vector<8x128xf32>
    %c0_i32_58 = arith.constant 0 : i32
    %148 = vector.broadcast %c0_i32_58 : i32 to vector<8x128xi32>
    %149 = arith.cmpi eq, %127, %148 : vector<8x128xi32>
    %c2_i32 = arith.constant 2 : i32
    %150 = vector.broadcast %c2_i32 : i32 to vector<8x128xi32>
    %151 = arith.cmpi eq, %128, %150 : vector<8x128xi32>
    %152 = arith.andi %149, %151 : vector<8x128xi1>
    %153 = arith.extui %152 : vector<8x128xi1> to vector<8x128xi32>
    %154 = arith.sitofp %153 : vector<8x128xi32> to vector<8x128xf32>
    %155 = vector.broadcast %79 : vector<1x1xf32> to vector<8x128xf32>
    %156 = arith.mulf %155, %154 : vector<8x128xf32>
    %157 = arith.addf %147, %156 : vector<8x128xf32>
    %c40_59 = arith.constant 40 : index
    %c0_60 = arith.constant 0 : index
    %158 = vector.load %arg4[%c40_59, %c0_60] : memref<48x128xf32, #tpu.memory_space<vmem>>, vector<8x128xf32>
    tpu.vector_store %arg4[%c40_59, %c0_60], %157 {strides = array<i32>} : memref<48x128xf32, #tpu.memory_space<vmem>>, vector<8x128xf32>,
    return
  }
}

</mosaic_0001>

<bundles_post_ra>
// kernel: _hrl_step.1
= control target key start
LH: loop header
LB: loop body
LE: loop exit
PB: predicated region body
PF: predicated region fallthrough
CT: control target
= control target key end

     0   :  { %vm71_vm0 = vcmask 261120   ;;  %vm109_vm1 = vcmask 130048   ;;  %vm175_vm2 = vcmask 1043456   ;;  %vm152_vm3 = vcmask 1040384   ;;  %s733_s28 = smov 124   ;;  %s734_s23 = smov 108   ;;  %s1020_s3 = inlined_call_operand.vmem [shape: f32[248,128], index: 3, kind: input, shape index: {}]   ;;  %s1021_s0 = inlined_call_operand.vmem [shape: f32[16,32], index: 0, kind: input, shape index: {}]   ;;  %s1022_s2 = inlined_call_operand.vmem [shape: f32[88,16], index: 2, kind: input, shape index: {}]   ;;  %s1023_s1 = inlined_call_operand.vmem [shape: f32[40,53], index: 1, kind: input, shape index: {}]   ;;  %s1024_s4 = inlined_call_operand.vmem [shape: f32[48,128], index: 4, kind: output, shape index: {}]  }
   0x1   :  { %v20_v0 = vld [vmem:[%s1020_s3 + $0x10] sm:$0xff]  ;;  %v21_v1 = vld [vmem:[%s1020_s3 + $0x18] sm:$0xff]  ;;  %v18_v2 = vld [vmem:[%s1020_s3] sm:$0xff]  ;;  %vm148_vm4 = vcmask 15360   ;;  %vm171_vm5 = vcmask 64512   ;;  %s736_s25 = smov 4  }
   0x2   :  { %v69_v3 = vpack.c.bf16 %v21_v1, %v20_v0  ;;  %v19_v4 = vld [vmem:[%s1020_s3 + $0x8] sm:$0xff]  ;;  %v65_v5 = vld [vmem:[%s1021_s0] sm:$0xff]  ;;  %v25_v15 = vld [vmem:[%s1020_s3 + $0x38] sm:$0xff]  ;;  %vm517_vm10 = vcmask 1041408   ;;  %vm466_vm11 = vcmask 31744   ;;  %vm492_vm12 = vcmask 293888  }
   0x3   :  { %v66_v6 = vld [vmem:[%s1021_s0 + $0x8] sm:$0xff]  ;;  %v68_v7 = vpack.c.bf16 %v19_v4, %v18_v2  ;;  %v697_v9 = vld [vmem:[%s1020_s3 + $0x20] ss:$0 sm:$0xff]  ;;  %v24_v20 = vld [vmem:[%s1020_s3 + $0x30] sm:$0xff]  ;;  %vm507_vm13 = vcmask 556032  }
   0x4   :  { %81 = vmatpush.bf16.msra.mxu2 %v69_v3  ;;  %v67_v8 = vpack.c.bf16 %v66_v6, %v65_v5  ;;  %v26_v16 = vld [vmem:[%s1020_s3 + $0x40] sm:$0xff]  ;;  %v23_v17 = vld [vmem:[%s1020_s3 + $0x28] sm:$0xff]  ;;  %v59_v44 = vld [vmem:[%s1022_s2 + $0x50] sm:$0xff] }
   0x5   :  { %v128_v19 = vpack.c.bf16 %v26_v16, %v25_v15  ;;  %v127_v23 = vpack.c.bf16 %v24_v20, %v23_v17  ;;  %v49_v38 = vld [vmem:[%s1022_s2] sm:$0x3]  ;;  %v170_v45 = vpack.c.bf16 %v59_v44, %v59_v44  ;;  %v698_v47 = vld [vmem:[%s1020_s3 + $0x48] ss:$0 sm:$0xff]  ;;  %v56_v55 = vld [vmem:[%s1022_s2 + $0x38] sm:$0xff] }
   0x6   :  { %v107_v40 = vpack.c.bf16 %v49_v38, %v49_v38  ;;  %v50_v50 = vld [vmem:[%s1022_s2 + $0x8] sm:$0xff]  ;;  %v57_v4 = vld [vmem:[%s1022_s2 + $0x40] sm:$0xff]  ;;  %v29_v38 = vld [vmem:[%s1020_s3 + $0x58] sm:$0xff] }
   0x7   :  { %v177_v46 = vsel %vm175_vm2, %v170_v45, 0  ;;  %v146_v53 = vpack.c.bf16 %v50_v50, %v50_v50  ;;  %v58_v5 = vld [vmem:[%s1022_s2 + $0x48] sm:$0xff]  ;;  %v837_v20 = vld [vmem:[%s1023_s1] sm:$0xff]  ;;  %v55_v44 = vld [vmem:[%s1022_s2 + $0x30] sm:$0xff] }
   0x8   :  { %82 = vmatpush.bf16.msra.mxu2 %v68_v7  ;;  %v217_v6 = vpack.c.bf16 %v58_v5, %v57_v4  ;;  %v263_v45 = vpack.c.bf16 %v55_v44, %v55_v44 }
   0xb   :  { %654 = vmatmul.msk.bf16.vlgmr.msra.gmra.mxu2 %vm71_vm0, %v67_v8 }
   0xc   :  { %139 = vmatpush.bf16.msrb.mxu2 %v128_v19 }
  0x10   :  { %140 = vmatpush.bf16.msrb.mxu2 %v127_v23  ;;  %v849_v23 = vld [vmem:[%s1023_s1 + $0x10] sm:$0xff] }
  0x8e   :  { %v84_v10 = vpop.f32.mrf.mxu2 }
  0x8f   :  { %v85_v11 = vadd.f32 %v697_v9, %v84_v10 }
  0x91   :  { %v89_v12 = vmul.f32 %v85_v11, %v85_v11 }
  0x93   :  { %v91_v13 = vmul.f32 %v89_v12, %v85_v11 }
  0x95   :  { %v93_v14 = vmul.f32 0.044715, %v91_v13 }
  0x96   :  { %v86_v18 = vpop.f32.mrf.mxu2 }
  0x97   :  { %v87_v21 = vadd.f32 %v697_v9, %v86_v18  ;;  %v95_v22 = vadd.f32 %v93_v14, %v85_v11 }
  0x99   :  { %v90_v24 = vmul.f32 %v87_v21, %v87_v21  ;;  %v97_v25 = vmul.f32 0.7978846, %v95_v22 }
  0x9b   :  { %v92_v26 = vmul.f32 %v90_v24, %v87_v21  ;;  %703 = vtanh.f32 %v97_v25  ;;  %v854_v24 = vld [vmem:[%s1023_s1 + $0x18] sm:$0xff] }
  0x9c   :  { %v346_v25 = vpack.c.bf16 %v854_v24, %v849_v23 }
  0x9d   :  { %v94_v27 = vmul.f32 0.044715, %v92_v26 }
  0x9f   :  { %v96_v28 = vadd.f32 %v94_v27, %v87_v21  ;;  %v51_v27 = vld [vmem:[%s1022_s2 + $0x10] sm:$0xff] }
  0xa1   :  { %v98_v29 = vmul.f32 0.7978846, %v96_v28  ;;  %v704_v30 = vpop.eup %703  ;;  %v52_v28 = vld [vmem:[%s1022_s2 + $0x18] sm:$0xff] }
  0xa2   :  { %v101_v31 = vadd.f32 1.0, %v704_v30 }
  0xa3   :  { %705 = vtanh.f32 %v98_v29 }
  0xa4   :  { %v103_v34 = vmul.f32 0.5, %v101_v31  ;;  %v261_v31 = vpack.c.bf16 %v52_v28, %v51_v27 }
  0xa6   :  { %v105_v36 = vmul.f32 %v103_v34, %v85_v11  ;;  %v28_v34 = vld [vmem:[%s1020_s3 + $0x50] sm:$0xff] }
  0xa9   :  { %v706_v32 = vpop.eup %705 }
  0xaa   :  { %v102_v33 = vadd.f32 1.0, %v706_v32  ;;  %v873_v32 = vld [vmem:[%s1023_s1 + $0x20] sm:$0xff] }
  0xac   :  { %v104_v35 = vmul.f32 0.5, %v102_v33  ;;  %v31_v33 = vld [vmem:[%s1020_s3 + $0x68] sm:$0xff] }
  0xae   :  { %v106_v37 = vmul.f32 %v104_v35, %v87_v21  ;;  %v842_v21 = vld [vmem:[%s1023_s1 + $0x8] sm:$0xff] }
  0xaf   :  { %v345_v22 = vpack.c.bf16 %v842_v21, %v837_v20 }
  0xb0   :  { %v108_v39 = vpack.c.bf16 %v106_v37, %v105_v36  ;;  %v347_v36 = vpack.c.bf16 %v873_v32, %v873_v32  ;;  %v303_v37 = vpack.c.bf16 %v31_v33, %v31_v33 }
  0xb1   :  { %353 = vrot.lane.b32.xlu1 %v345_v22, %s733_s28 }
  0xb2   :  { %120 = vmatpush.bf16.msra.mxu1 %v108_v39  ;;  %v348_v39 = vpack.c.bf16 %v29_v38, %v28_v34  ;;  %357 = vrot.lane.b32.xlu2 %v347_v36, %s733_s28 }
  0xb5   :  { %655 = vmatmul.msk.bf16.vlgmr.msra.gmra.mxu1 %vm109_vm1, %v107_v40  ;;  %v315_v40 = vsel %vm175_vm2, %v303_v37, 0 }
  0xb6   :  { %186 = vmatpush.bf16.msrb.mxu1 %v177_v46  ;;  %324 = vmatpush.bf16.msra.mxu2 %v315_v40 }
  0xb9   :  { %355 = vrot.lane.b32.xlu1 %v346_v25, %s733_s28  ;;  %s737_s28 = smov 36  }
  0xba   :  { %375 = vmatpush.bf16.msra.mxu1 %v348_v39  ;;  %401 = vrot.lane.b32.xlu2 %v837_v20, %s734_s23 }
 0x123   :  { %v354_v46 = vpop.permute.xlu1 %353 }
 0x132   :  { %v122_v41 = vpop.f32.mrf.mxu1 }
 0x133   :  { %v126_v42 = vpack.c.bf16 %v122_v41, %v122_v41  ;;  %v53_v41 = vld [vmem:[%s1022_s2 + $0x20] sm:$0xff] }
 0x135   :  { %656 = vmatmul.msk.bf16.vlgmr.msrb.gmra.mxu2 %vm71_vm0, %v126_v42  ;;  %v54_v42 = vld [vmem:[%s1022_s2 + $0x28] sm:$0xff] }
 0x13a   :  { %v124_v43 = vpop.f32.mrf.mxu1 }
 0x13b   :  { %v262_v43 = vpack.c.bf16 %v54_v42, %v53_v41 }
 0x1b8   :  { %v142_v48 = vpop.f32.mrf.mxu2 }
 0x1b9   :  { %v143_v49 = vadd.f32 %v698_v47, %v142_v48  ;;  %v356_v47 = vpop.permute.xlu1 %355  ;;  %v735_v48 = vmov 52  }
 0x1ba   :  { %684 = vset.pattern.permute.xlu1 %v735_v48  ;;  %685 = vset.pattern.permute.xlu2 %v735_v48 }
 0x1bb   :  { %v147_v51 = vpack.c.bf16 %v143_v49, %v143_v49  ;;  %422 = vperm.xlu1 %684, %v837_v20   ;;  %426 = vperm.xlu2 %685, %v842_v21  }
 0x1bc   :  { %696 = vset.pattern.permute.xlu0 %v735_v48 }
 0x1bd   :  { %v154_v52 = vsel %vm152_vm3, %v147_v51, 0 }
 0x1be   :  { %163 = vmatpush.bf16.msra.mxu3 %v154_v52  ;;  %v358_v52 = vpop.permute.xlu2 %357 }
 0x1c0   :  { %v144_v54 = vpop.f32.mrf.mxu2 }
 0x1c1   :  { %657 = vmatmul.msk.bf16.vlgmr.msra.gmra.mxu3 %vm148_vm4, %v146_v53 }
 0x1c2   :  { %228 = vmatpush.bf16.msrb.mxu3 %v217_v6 }
 0x1c3   :  { %405 = vrot.lane.b32.xlu1 %v849_v23, %s734_s23  ;;  %407 = vrot.lane.b32.xlu2 %v854_v24, %s734_s23 }
 0x1cb   :  { %430 = vperm.xlu1 %684, %v849_v23   ;;  %434 = vperm.xlu2 %685, %v854_v24  }
 0x1d3   :  { %438 = vperm.xlu1 %684, %v873_v32  }
 0x244   :  { %v165_v56 = vpop.f32.mrf.mxu3 }
 0x245   :  { %v816_v57 = vadd.f32 %v165_v56, %v56_v55 }
 0x247   :  { %v169_v58 = vpack.c.bf16 %v816_v57, %v816_v57 }
 0x249   :  { %658 = vmatmul.msk.bf16.vlgmr.msrb.gmra.mxu1 %vm171_vm5, %v169_v58 }
 0x24c   :  { %v167_v59 = vpop.f32.mrf.mxu3 }
 0x259   :  { %666 = vmatmul.msk.bf16.vlgmr.msra.gmra.mxu1 %vm109_vm1, %v354_v46 }
 0x269   :  { %667 = vmatmul.msk.bf16.gmra.mxu1 %vm109_vm1, %v356_v47 }
 0x279   :  { %668 = vmatmul.msk.bf16.gmra.mxu1 %vm109_vm1, %v358_v52 }
 0x2c6   :  { %v188_v60 = vpop.f32.mrf.mxu1 }
 0x2c7   :  { %v192_v61 = vsel %vm109_vm1, %v188_v60, -inf }
 0x2c8   :  { %193 = vmax.xlane.f32.xlu0 %v192_v61 }
 0x2ce   :  { %v190_v62 = vpop.f32.mrf.mxu1 }
 0x2cf   :  { %v699_v62 = vld [vmem:[%s1020_s3 + $0x60] ss:$0 sm:$0xff] }
 0x33b   :  { %v194_v63 = vpop.xlane.xlu0 %193 }
 0x33c   :  { %v195_v0 = vsub.f32 %v188_v60, %v194_v63  ;;  %v377_v60 = vpop.f32.mrf.mxu1  ;;  %v402_v63 = vpop.permute.xlu2 %401 }
 0x33e   :  { %v196_v1 = vmul.f32 1.442695, %v195_v0  ;;  %v378_v0 = vadd.f32 %v699_v62, %v377_v60  ;;  %v41_v60 = vld [vmem:[%s1020_s3 + $0xb8] sm:$0xf] }
 0x340   :  { %707 = vpow2.f32 %v196_v1 }
 0x344   :  { %v379_v61 = vpop.f32.mrf.mxu1 }
 0x346   :  { %v708_v2 = vpop.eup %707 }
 0x347   :  { %v198_v3 = vsel %vm109_vm1, %v708_v2, 0.0 }
 0x348   :  { %199 = vadd.xlane.f32.xlu0 %v198_v3  ;;  %v427_v3 = vpop.permute.xlu2 %426 }
 0x34c   :  { %v382_v1 = vpop.f32.mrf.mxu1 }
 0x354   :  { %v384_v4 = vpop.f32.mrf.mxu1 }
 0x355   :  { %v385_v6 = vadd.f32 %v699_v62, %v384_v4 }
 0x35c   :  { %403 = vrot.lane.b32.xlu0 %v842_v21, %s734_s23 }
 0x364   :  { %409 = vrot.lane.b32.xlu0 %v873_v32, %s734_s23 }
 0x3bb   :  { %v200_v7 = vpop.xlane.xlu0 %199 }
 0x3bc   :  { %709 = vrcp.f32 %v200_v7  ;;  %v212_v11 = vand.u32 2147483648, %v200_v7  ;;  %v210_v13 = vand.u32 2147483647, %v200_v7  ;;  %vm206_vm7 = vweird.f32 %v200_v7 }
 0x3bd   :  { %711 = vtanh.f32 %v378_v0 }
 0x3be   :  { %v213_v15 = vor.u32 1.1754944e-38, %v212_v11  ;;  %vm211_vm9 = vcmp.eq.f32.partialorder %v210_v13, 8.507059e+37  ;;  %v383_v11 = vadd.f32 %v699_v62, %v382_v1  ;;  %v423_v13 = vpop.permute.xlu1 %422 }
 0x3c2   :  { %v710_v8 = vpop.eup %709 }
 0x3c3   :  { %v202_v9 = vmul.f32 %v710_v8, %v200_v7  ;;  %vm207_vm6 = vweird.f32 %v710_v8  ;;  %v712_v5 = vpop.eup %711 }
 0x3c4   :  { %vm208_vm8 = vmor %vm206_vm7, %vm207_vm6 }
 0x3c5   :  { %v203_v10 = vsub.f32 1.0, %v202_v9 }
 0x3c6   :  { %v406_v22 = vpop.permute.xlu1 %405 }
 0x3c7   :  { %v204_v12 = vmul.f32 %v710_v8, %v203_v10 }
 0x3c9   :  { %v205_v14 = vadd.f32 %v710_v8, %v204_v12  ;;  %v408_v12 = vpop.permute.xlu2 %407 }
 0x3cb   :  { %v209_v16 = vsel %vm208_vm8, %v710_v8, %v205_v14  ;;  %v416_v8 = vadd.f32 %v712_v5, %v402_v63  ;;  %v40_v63 = vld [vmem:[%s1020_s3 + $0xb0] sm:$0xff]  ;;  %v35_v5 = vld [vmem:[%s1020_s3 + $0x88] sm:$0xff] }
 0x3cc   :  { %v214_v17 = vsel %vm211_vm9, %v213_v15, %v209_v16 }
 0x3cd   :  { %v829_v18 = vmul.f32 %v708_v2, %v214_v17  ;;  %v380_v2 = vadd.f32 %v699_v62, %v379_v61  ;;  %v441_v15 = vmul.f32 %v423_v13, %v416_v8  ;;  %v505_v61 = vpack.c.bf16 %v41_v60, %v41_v60  ;;  %v33_v8 = vld [vmem:[%s1020_s3 + $0x78] sm:$0xff] }
 0x3ce   :  { %v404_v9 = vpop.permute.xlu0 %403 }
 0x3cf   :  { %v216_v19 = vpack.c.bf16 %v829_v18, %v829_v18  ;;  %713 = vtanh.f32 %v380_v2  ;;  %451 = vrot.lane.b32.xlu2 %v441_v15, %s736_s25  ;;  %v519_v0 = vsel %vm517_vm10, %v505_v61, 0  ;;  %v37_v2 = vld [vmem:[%s1020_s3 + $0x98] sm:$0xff] }
 0x3d0   :  { %715 = vtanh.f32 %v385_v6  ;;  %524 = vmatpush.bf16.msra.mxu3 %v519_v0  ;;  %v36_v6 = vld [vmem:[%s1020_s3 + $0x90] sm:$0xff] }
 0x3d1   :  { %659 = vmatmul.msk.bf16.vlgmr.msrb.gmra.mxu3 %vm109_vm1, %v216_v19  ;;  %717 = vtanh.f32 %v383_v11  ;;  %v435_v19 = vpop.permute.xlu2 %434 }
 0x3d5   :  { %v714_v7 = vpop.eup %713 }
 0x3d6   :  { %v417_v10 = vadd.f32 %v714_v7, %v404_v9  ;;  %v716_v16 = vpop.eup %715  ;;  %v410_v38 = vpop.permute.xlu0 %409  ;;  %v502_v7 = vpack.c.bf16 %v36_v6, %v35_v5  ;;  %v34_v9 = vld [vmem:[%s1020_s3 + $0x80] sm:$0xff] }
 0x3d7   :  { %v419_v17 = vadd.f32 %v716_v16, %v408_v12  ;;  %v718_v27 = vpop.eup %717 }
 0x3d8   :  { %v442_v14 = vmul.f32 %v427_v3, %v417_v10  ;;  %v418_v28 = vadd.f32 %v718_v27, %v406_v22  ;;  %v38_v3 = vld [vmem:[%s1020_s3 + $0xa0] sm:$0xff]  ;;  %v501_v10 = vpack.c.bf16 %v34_v9, %v33_v8  ;;  %v47_v27 = vld [vmem:[%s1020_s3 + $0xe8] sm:$0xf] }
 0x3d9   :  { %v444_v25 = vmul.f32 %v435_v19, %v419_v17  ;;  %v503_v4 = vpack.c.bf16 %v38_v3, %v37_v2 }
 0x3da   :  { %453 = vrot.lane.b32.xlu0 %v442_v14, %s736_s25 }
 0x3e2   :  { %457 = vrot.lane.b32.xlu0 %v444_v25, %s736_s25 }
 0x429   :  { %v452_v11 = vpop.permute.xlu2 %451 }
 0x42a   :  { %v467_v16 = vsel %vm466_vm11, %v837_v20, %v452_v11  ;;  %v45_v20 = vld [vmem:[%s1020_s3 + $0xd8] sm:$0xff] }
 0x44c   :  { %v454_v12 = vpop.permute.xlu0 %453 }
 0x44d   :  { %v468_v17 = vsel %vm466_vm11, %v842_v21, %v454_v12  ;;  %v46_v21 = vld [vmem:[%s1020_s3 + $0xe0] sm:$0xff] }
 0x454   :  { %v858_v26 = vpop.f32.mrf.mxu3 }
 0x455   :  { %v264_v29 = vpack.c.bf16 %v858_v26, %v858_v26 }
 0x457   :  { %v275_v30 = vsel %vm175_vm2, %v264_v29, 0  ;;  %v431_v29 = vpop.permute.xlu1 %430 }
 0x458   :  { %284 = vmatpush.bf16.msra.mxu0 %v275_v30  ;;  %v443_v30 = vmul.f32 %v431_v29, %v418_v28  ;;  %v585_v28 = vpack.c.bf16 %v47_v27, %v47_v27 }
 0x45a   :  { %455 = vrot.lane.b32.xlu2 %v443_v30, %s736_s25  ;;  %v597_v29 = vsel %vm517_vm10, %v585_v28, 0  ;;  %v584_v30 = vpack.c.bf16 %v46_v21, %v45_v20 }
 0x45b   :  { %660 = vmatmul.msk.bf16.vlgmr.msra.gmra.mxu0 %vm171_vm5, %v261_v31  ;;  %v387_v31 = vpop.f32.mrf.mxu1 }
 0x45c   :  { %v232_v35 = vpop.f32.mrf.mxu3  ;;  %v388_v33 = vadd.f32 %v699_v62, %v387_v31  ;;  %v39_v62 = vld [vmem:[%s1020_s3 + $0xa8] sm:$0xff]  ;;  %604 = vmatpush.bf16.msrb.mxu0 %v597_v29 }
 0x45d   :  { %v700_v35 = vld [vmem:[%s1020_s3 + $0x70] ss:$0 sm:$0xff]  ;;  %v504_v1 = vpack.c.bf16 %v40_v63, %v39_v62  ;;  %v43_v31 = vld [vmem:[%s1020_s3 + $0xc8] sm:$0xff] }
 0x45e   :  { %719 = vtanh.f32 %v388_v33  ;;  %v44_v33 = vld [vmem:[%s1020_s3 + $0xd0] sm:$0xff] }
 0x45f   :  { %v439_v39 = vpop.permute.xlu1 %438  ;;  %525 = vmatpush.bf16.msra.mxu3 %v504_v1 }
 0x460   :  { %605 = vmatpush.bf16.msrb.mxu0 %v584_v30 }
 0x463   :  { %v389_v36 = vpop.f32.mrf.mxu1  ;;  %526 = vmatpush.bf16.msra.mxu3 %v503_v4 }
 0x464   :  { %v720_v37 = vpop.eup %719  ;;  %v458_v36 = vpop.permute.xlu0 %457 }
 0x465   :  { %v420_v40 = vadd.f32 %v720_v37, %v410_v38 }
 0x467   :  { %v445_v42 = vmul.f32 %v439_v39, %v420_v40  ;;  %527 = vmatpush.bf16.msra.mxu3 %v502_v7 }
 0x469   :  { %459 = vrot.lane.b32.xlu2 %v445_v42, %s736_s25 }
 0x46b   :  { %661 = vmatmul.msk.bf16.gmra.mxu0 %vm171_vm5, %v262_v43  ;;  %528 = vmatpush.bf16.msra.mxu3 %v501_v10  ;;  %v249_v10 = vsub.f32 %v816_v57, %v858_v26  ;;  %v702_v57 = vld [vmem:[%s1020_s3 + $0xf0] ss:$0 sm:$0xff] }
 0x47b   :  { %662 = vmatmul.msk.bf16.gmra.mxu0 %vm171_vm5, %v263_v45 }
 0x4d8   :  { %v286_v49 = vpop.f32.mrf.mxu0 }
 0x4e0   :  { %v288_v50 = vpop.f32.mrf.mxu0 }
 0x4e1   :  { %v300_v51 = vpack.c.bf16 %v288_v50, %v286_v49 }
 0x4e3   :  { %663 = vmatmul.msk.bf16.vlgmr.msra.gmra.mxu2 %vm171_vm5, %v300_v51 }
 0x4e8   :  { %v291_v53 = vpop.f32.mrf.mxu0 }
 0x4f0   :  { %v293_v54 = vpop.f32.mrf.mxu0 }
 0x4f1   :  { %v301_v55 = vpack.c.bf16 %v293_v54, %v291_v53 }
 0x4f3   :  { %664 = vmatmul.msk.bf16.gmra.mxu2 %vm171_vm5, %v301_v55 }
 0x4f8   :  { %v296_v56 = vpop.f32.mrf.mxu0 }
 0x4f9   :  { %v302_v58 = vpack.c.bf16 %v296_v56, %v296_v56 }
 0x500   :  { %v298_v59 = vpop.f32.mrf.mxu0 }
 0x503   :  { %665 = vmatmul.msk.bf16.gmra.mxu2 %vm171_vm5, %v302_v58 }
 0x566   :  { %v326_v34 = vpop.f32.mrf.mxu2 }
 0x567   :  { %v327_v41 = vadd.f32 %v700_v35, %v326_v34  ;;  %v583_v34 = vpack.c.bf16 %v44_v33, %v43_v31 }
 0x569   :  { %721 = vtanh.f32 %v327_v41  ;;  %v470_v41 = vsel %vm466_vm11, %v854_v24, %v458_v36  ;;  %606 = vmatpush.bf16.msrb.mxu0 %v583_v34 }
 0x56e   :  { %v328_v43 = vpop.f32.mrf.mxu2 }
 0x56f   :  { %v329_v44 = vadd.f32 %v700_v35, %v328_v43  ;;  %v722_v45 = vpop.eup %721 }
 0x571   :  { %723 = vtanh.f32 %v329_v44 }
 0x576   :  { %v331_v46 = vpop.f32.mrf.mxu2 }
 0x577   :  { %v724_v47 = vpop.eup %723  ;;  %v332_v49 = vadd.f32 %v700_v35, %v331_v46 }
 0x578   :  { %v686_v48 = vpack.i.bf16 %v724_v47, %v722_v45 }
 0x579   :  { %725 = vtanh.f32 %v332_v49 }
 0x57a   :  { %687 = vrot.lane.b32.xlu1 %v686_v48, %s737_s28 }
 0x57e   :  { %v333_v50 = vpop.f32.mrf.mxu2 }
 0x57f   :  { %v334_v51 = vadd.f32 %v700_v35, %v333_v50  ;;  %v726_v52 = vpop.eup %725 }
 0x581   :  { %727 = vtanh.f32 %v334_v51 }
 0x586   :  { %v336_v53 = vpop.f32.mrf.mxu2 }
 0x587   :  { %v728_v54 = vpop.eup %727  ;;  %v337_v55 = vadd.f32 %v700_v35, %v336_v53  ;;  %v456_v35 = vpop.permute.xlu2 %455 }
 0x588   :  { %v691_v56 = vpack.i.bf16 %v728_v54, %v726_v52  ;;  %v469_v40 = vsel %vm466_vm11, %v849_v23, %v456_v35  ;;  %v701_v23 = vld [vmem:[%s1020_s3 + $0xc0] ss:$0 sm:$0xff] }
 0x589   :  { %729 = vtanh.f32 %v337_v55 }
 0x58a   :  { %692 = vrot.lane.b32.xlu1 %v691_v56, %s737_s28 }
 0x58e   :  { %v338_v58 = vpop.f32.mrf.mxu2 }
 0x58f   :  { %v730_v59 = vpop.eup %729  ;;  %v460_v45 = vpop.permute.xlu2 %459 }
 0x590   :  { %485 = vrot.lane.b32.xlu0 %v730_v59, %s737_s28  ;;  %v471_v47 = vsel %vm466_vm11, %v873_v32, %v460_v45  ;;  %v234_v32 = vadd.f32 1e-08, %v829_v18  ;;  %v627_v45 = vlaneseq }
 0x592   :  { %731 = vlog2.f32 %v234_v32 }
 0x598   :  { %v732_v0 = vpop.eup %731 }
 0x599   :  { %v236_v3 = vmul.f32 0.6931472, %v732_v0 }
 0x59b   :  { %v237_v8 = vmul.f32 %v236_v3, %v829_v18 }
 0x59d   :  { %v238_v12 = vsel %vm109_vm1, %v237_v8, 0.0 }
 0x5ec   :  { %v688_v13 = vpop.permute.xlu1 %687 }
 0x5ed   :  { %v690_v14 = vunpack.i.h.bf16 %v688_v13  ;;  %v689_v15 = vunpack.i.l.bf16 %v688_v13 }
 0x5ef   :  { %v493_v19 = vsel %vm492_vm12, %v467_v16, %v689_v15  ;;  %v494_v22 = vsel %vm492_vm12, %v468_v17, %v690_v14  ;;  %v250_v15 = vmul.f32 %v249_v10, %v249_v10 }
 0x5f0   :  { %v498_v25 = vpack.c.bf16 %v494_v22, %v493_v19 }
 0x5f1   :  { %v251_v19 = vsel %vm171_vm5, %v250_v15, 0.0 }
 0x5f2   :  { %669 = vmatmul.msk.bf16.vlgmr.msra.gmra.mxu3 %vm507_vm13, %v498_v25 }
 0x5fc   :  { %v693_v37 = vpop.permute.xlu1 %692 }
 0x5fd   :  { %v695_v38 = vunpack.i.h.bf16 %v693_v37  ;;  %v694_v39 = vunpack.i.l.bf16 %v693_v37 }
 0x5ff   :  { %v495_v42 = vsel %vm492_vm12, %v469_v40, %v694_v39  ;;  %v496_v43 = vsel %vm492_vm12, %v470_v41, %v695_v38 }
 0x600   :  { %v499_v44 = vpack.c.bf16 %v496_v43, %v495_v42 }
 0x602   :  { %670 = vmatmul.msk.bf16.gmra.mxu3 %vm507_vm13, %v499_v44  ;;  %v486_v46 = vpop.permute.xlu0 %485 }
 0x603   :  { %v497_v48 = vsel %vm492_vm12, %v471_v47, %v486_v46 }
 0x604   :  { %v500_v49 = vpack.c.bf16 %v497_v48, %v497_v48 }
 0x612   :  { %671 = vmatmul.msk.bf16.gmra.mxu3 %vm507_vm13, %v500_v49 }
 0x675   :  { %v530_v24 = vpop.f32.mrf.mxu3 }
 0x676   :  { %v531_v50 = vadd.f32 %v701_v23, %v530_v24  ;;  %v628_v24 = vshrl.u32 %v627_v45, 7 }
 0x678   :  { %v544_v51 = vsub.f32 %v531_v50, %v467_v16  ;;  %vm631_vm0 = vcmp.eq.s32.totalorder %v628_v24, 0 }
 0x67a   :  { %v549_v52 = vmul.f32 %v544_v51, %v544_v51 }
 0x67c   :  { %v554_v53 = vsel %vm492_vm12, %v549_v52, 0.0 }
 0x67d   :  { %v532_v54 = vpop.f32.mrf.mxu3  ;;  %555 = vadd.xlane.f32.xlu1 %v554_v53 }
 0x67e   :  { %v533_v55 = vadd.f32 %v701_v23, %v532_v54 }
 0x680   :  { %v545_v56 = vsub.f32 %v533_v55, %v468_v17  ;;  %v580_v58 = vpack.c.bf16 %v533_v55, %v531_v50  ;;  %v630_v50 = vand.u32 127, %v627_v45 }
 0x682   :  { %672 = vmatmul.msk.bf16.vlgmr.msrb.gmra.mxu0 %vm492_vm12, %v580_v58  ;;  %v550_v59 = vmul.f32 %v545_v56, %v545_v56  ;;  %vm632_vm14 = vcmp.eq.s32.totalorder %v630_v50, 0  ;;  %vm637_vm15 = vcmp.eq.s32.totalorder %v630_v50, 1  ;;  %vm643_vm1 = vcmp.eq.s32.totalorder %v630_v50, 2 }
 0x683   :  { %vm633_vm2 = vmand %vm631_vm0, %vm632_vm14 }
 0x684   :  { %v557_v60 = vsel %vm492_vm12, %v550_v59, 0.0  ;;  %vm638_vm3 = vmand %vm631_vm0, %vm637_vm15 }
 0x685   :  { %558 = vadd.xlane.f32.xlu2 %v557_v60  ;;  %v535_v61 = vpop.f32.mrf.mxu3  ;;  %vm644_vm4 = vmand %vm631_vm0, %vm643_vm1 }
 0x686   :  { %v536_v62 = vadd.f32 %v701_v23, %v535_v61 }
 0x688   :  { %v546_v63 = vsub.f32 %v536_v62, %v469_v40 }
 0x68a   :  { %v551_v1 = vmul.f32 %v546_v63, %v546_v63 }
 0x68c   :  { %v560_v2 = vsel %vm492_vm12, %v551_v1, 0.0  ;;  %v738_v1 = vmov 0.0  }
 0x68d   :  { %v537_v4 = vpop.f32.mrf.mxu3  ;;  %561 = vadd.xlane.f32.xlu0 %v560_v2  ;;  %v675_v2 = vsel %vm633_vm2, 1.0, %v738_v1  ;;  %v676_v3 = vsel %vm638_vm3, 1.0, %v738_v1 }
 0x68e   :  { %v538_v5 = vadd.f32 %v701_v23, %v537_v4 }
 0x690   :  { %v547_v6 = vsub.f32 %v538_v5, %v470_v41  ;;  %v581_v7 = vpack.c.bf16 %v538_v5, %v536_v62 }
 0x692   :  { %673 = vmatmul.msk.bf16.gmra.mxu0 %vm492_vm12, %v581_v7  ;;  %v552_v9 = vmul.f32 %v547_v6, %v547_v6  ;;  %v677_v7 = vsel %vm644_vm4, 1.0, %v738_v1 }
 0x694   :  { %v563_v11 = vsel %vm492_vm12, %v552_v9, 0.0 }
 0x695   :  { %564 = vadd.xlane.f32.xlu2 %v563_v11  ;;  %239 = vadd.xlane.f32.xlu0 %v238_v12  ;;  %v540_v13 = vpop.f32.mrf.mxu3 }
 0x696   :  { %v541_v14 = vadd.f32 %v701_v23, %v540_v13 }
 0x698   :  { %v548_v16 = vsub.f32 %v541_v14, %v471_v47  ;;  %v582_v25 = vpack.c.bf16 %v541_v14, %v541_v14 }
 0x69a   :  { %v553_v17 = vmul.f32 %v548_v16, %v548_v16 }
 0x69c   :  { %v566_v18 = vsel %vm492_vm12, %v553_v17, 0.0 }
 0x69d   :  { %252 = vadd.xlane.f32.xlu2 %v251_v19  ;;  %v542_v22 = vpop.f32.mrf.mxu3  ;;  %567 = vadd.xlane.f32.xlu1 %v566_v18 }
 0x6a2   :  { %674 = vmatmul.msk.bf16.gmra.mxu0 %vm492_vm12, %v582_v25 }
 0x6f0   :  { %v556_v21 = vpop.xlane.xlu1 %555 }
 0x6f8   :  { %v559_v27 = vpop.xlane.xlu2 %558 }
 0x6f9   :  { %v569_v35 = vadd.f32 %v559_v27, %v556_v21 }
 0x6ff   :  { %v608_v26 = vpop.f32.mrf.mxu0 }
 0x700   :  { %v609_v28 = vadd.f32 %v702_v57, %v608_v26  ;;  %v562_v20 = vpop.xlane.xlu0 %561 }
 0x701   :  { %v570_v37 = vadd.f32 %v569_v35, %v562_v20 }
 0x702   :  { %622 = vst [vmem:[%s1024_s4] sm:$0xff] %v609_v28 }
 0x707   :  { %v610_v29 = vpop.f32.mrf.mxu0 }
 0x708   :  { %v611_v30 = vadd.f32 %v702_v57, %v610_v29  ;;  %v240_v31 = vpop.xlane.xlu0 %239  ;;  %v565_v33 = vpop.xlane.xlu2 %564 }
 0x709   :  { %v241_v34 = vsub.f32 0.0, %v240_v31  ;;  %v571_v40 = vadd.f32 %v570_v37, %v565_v33 }
 0x70a   :  { %623 = vst [vmem:[%s1024_s4 + $0x8] sm:$0xff] %v611_v30 }
 0x70b   :  { %v242_v36 = vrot.slane %v241_v34, 4 }
 0x70d   :  { %v243_v38 = vadd.f32 %v242_v36, %v241_v34 }
 0x70f   :  { %v244_v39 = vrot.slane %v243_v38, 2  ;;  %v613_v41 = vpop.f32.mrf.mxu0 }
 0x710   :  { %v614_v42 = vadd.f32 %v702_v57, %v613_v41  ;;  %v568_v43 = vpop.xlane.xlu1 %567  ;;  %v253_v44 = vpop.xlane.xlu2 %252 }
 0x711   :  { %v572_v46 = vadd.f32 %v571_v40, %v568_v43  ;;  %v254_v47 = vrot.slane %v253_v44, 4  ;;  %v245_v48 = vadd.f32 %v244_v39, %v243_v38 }
 0x712   :  { %624 = vst [vmem:[%s1024_s4 + $0x10] sm:$0xff] %v614_v42 }
 0x713   :  { %v573_v49 = vrot.slane %v572_v46, 4  ;;  %v255_v23 = vadd.f32 %v254_v47, %v253_v44  ;;  %v246_v53 = vrot.slane %v245_v48, 1 }
 0x715   :  { %v574_v51 = vadd.f32 %v573_v49, %v572_v46  ;;  %v256_v52 = vrot.slane %v255_v23, 2  ;;  %v247_v60 = vadd.f32 %v246_v53, %v245_v48 }
 0x717   :  { %v575_v54 = vrot.slane %v574_v51, 2  ;;  %v257_v55 = vadd.f32 %v256_v52, %v255_v23  ;;  %v615_v32 = vpop.f32.mrf.mxu0  ;;  %v248_v4 = vmul.f32 0.125, %v247_v60 }
 0x718   :  { %v616_v56 = vadd.f32 %v702_v57, %v615_v32 }
 0x719   :  { %v576_v58 = vadd.f32 %v575_v54, %v574_v51  ;;  %v258_v59 = vrot.slane %v257_v55, 1  ;;  %v647_v11 = vmul.f32 %v677_v7, %v248_v4 }
 0x71a   :  { %625 = vst [vmem:[%s1024_s4 + $0x18] sm:$0xff] %v616_v56 }
 0x71b   :  { %v577_v61 = vrot.slane %v576_v58, 1  ;;  %v259_v62 = vadd.f32 %v258_v59, %v257_v55 }
 0x71d   :  { %v578_v63 = vadd.f32 %v577_v61, %v576_v58  ;;  %v260_v0 = vmul.f32 0.015625, %v259_v62 }
 0x71f   :  { %v579_v5 = vmul.f32 0.00069444446, %v578_v63  ;;  %v618_v6 = vpop.f32.mrf.mxu0  ;;  %v641_v10 = vmul.f32 %v676_v3, %v260_v0 }
 0x720   :  { %v619_v8 = vadd.f32 %v702_v57, %v618_v6 }
 0x721   :  { %v636_v9 = vmul.f32 %v675_v2, %v579_v5 }
 0x722   :  { %626 = vst [vmem:[%s1024_s4 + $0x20] sm:$0xff] %v619_v8 }
 0x723   :  { %v642_v12 = vadd.f32 %v641_v10, %v636_v9 }
 0x725   :  { %v648_v13 = vadd.f32 %v647_v11, %v642_v12 }
 0x727   :  { %649 = vst [vmem:[%s1024_s4 + $0x28] sm:$0xff] %v648_v13  ;;  %v620_v14 = vpop.f32.mrf.mxu0 }

</bundles_post_ra>
